<compile_context>
chip_gen: v6e
topology: v6e:2x2x1
jax: 0.10.0
libtpu: 0.0.40
codegen_flags: <defaults>
</compile_context>

<pallas_src>
import math

import jax
import jax.numpy as jnp
from jax.experimental import pallas as pl
from jax.experimental.pallas import tpu as pltpu

_INV_SQRT2 = 1.0 / math.sqrt(2.0)


def _intermediate_kernel(x_ref, e_ref, w1_ref, w2_ref, b_ref, o_ref):
    # Single f32 accumulator for both matmuls (MXU, f32 accumulation).
    acc = jnp.dot(x_ref[...], w1_ref[...], preferred_element_type=jnp.float32)
    acc = acc + jnp.dot(e_ref[...], w2_ref[...], preferred_element_type=jnp.float32)
    s = acc + b_ref[...]  # fused bias (b1 + b2), broadcast over rows
    # exact erf-based GELU (matches the PyTorch reference, not the tanh approx)
    g = s * 0.5 * (1.0 + jax.lax.erf(s * _INV_SQRT2))
    o_ref[...] = g.astype(o_ref.dtype)


def _round_up(x, m):
    return (x + m - 1) // m * m


def intermediate_layer(hidden_states, hidden_states_ent, w1, b1, w2, b2, *, tile_m=1024):
    """hidden_states: [B, S, D], hidden_states_ent: [B, S, 512].
    w1: [D, I], b1: [I], w2: [512, I], b2: [I]. Returns [B, S, I]."""
    B, S, D = hidden_states.shape
    E = hidden_states_ent.shape[-1]
    I = w1.shape[1]
    M = B * S

    out_dtype = jnp.result_type(hidden_states.dtype, hidden_states_ent.dtype,
                                w1.dtype, w2.dtype)

    # Flatten [B, S, *] -> [M, *]; keep native dtypes (bf16 inputs stay bf16 ->
    # half the HBM bytes; accumulation is f32 inside the kernel).
    x = hidden_states.reshape(M, D)
    e = hidden_states_ent.reshape(M, E)

    # Lane-dense output: pad intermediate dim to a multiple of 128 so every
    # MXU result pop / VPU op / store works on full vregs.
    I_pad = _round_up(I, 128)
    if I_pad != I:
        w1 = jnp.pad(w1, ((0, 0), (0, I_pad - I)))
        w2 = jnp.pad(w2, ((0, 0), (0, I_pad - I)))
        b1 = jnp.pad(b1, (0, I_pad - I))
        b2 = jnp.pad(b2, (0, I_pad - I))
    # Fuse the two bias adds into one resident (1, I_pad) f32 vector.
    b = (b1.astype(jnp.float32) + b2.astype(jnp.float32)).reshape(1, I_pad)

    # Tile over rows. Block dims must be multiples of 8 or equal the full dim.
    tm = min(tile_m, M)
    if tm % 8 != 0:
        tm = M
    grid = (pl.cdiv(M, tm),)

    itemsize = lambda a: a.size * a.dtype.itemsize
    flops = 2 * M * (D + E) * I_pad + 8 * M * I_pad
    bytes_accessed = (itemsize(x) + itemsize(e) + itemsize(w1) + itemsize(w2)
                      + itemsize(b) + M * I_pad * jnp.dtype(out_dtype).itemsize)

    out = pl.pallas_call(
        _intermediate_kernel,
        out_shape=jax.ShapeDtypeStruct((M, I_pad), out_dtype),
        grid=grid,
        in_specs=[
            pl.BlockSpec((tm, D), lambda i: (i, 0)),      # x tile (pipelined)
            pl.BlockSpec((tm, E), lambda i: (i, 0)),      # e tile (pipelined)
            pl.BlockSpec((D, I_pad), lambda i: (0, 0)),   # W1 resident
            pl.BlockSpec((E, I_pad), lambda i: (0, 0)),   # W2 resident
            pl.BlockSpec((1, I_pad), lambda i: (0, 0)),   # fused bias resident
        ],
        out_specs=pl.BlockSpec((tm, I_pad), lambda i: (i, 0)),
        compiler_params=pltpu.CompilerParams(
            dimension_semantics=("parallel",),            # megacore / 2-TC sharding
            vmem_limit_bytes=48 << 20,                    # headroom on v7x's 64 MiB VMEM
        ),
        cost_estimate=pl.CostEstimate(
            flops=flops,
            transcendentals=M * I_pad,
            bytes_accessed=bytes_accessed,
        ),
    )(x, e, w1, w2, b)

    if I_pad != I:
        out = out[:, :I]
    return out.reshape(B, S, I)


def _reference(hidden_states, hidden_states_ent, w1, b1, w2, b2):
    h = jnp.einsum("bsd,di->bsi", hidden_states, w1) + b1
    he = jnp.einsum("bse,ei->bsi", hidden_states_ent, w2) + b2
    s = h + he
    return s * 0.5 * (1.0 + jax.lax.erf(s / jnp.sqrt(2.0)))


if __name__ == "__main__":
    # small shapes consistent with the module:
    #   size = 32, intermediate_size = 64; dense_ent input dim is fixed at 512.
    B, S, D, E, I = 2, 8, 32, 512, 64

    key = jax.random.PRNGKey(0)
    k_x, k_e, k_w1, k_b1, k_w2, k_b2 = jax.random.split(key, 6)

    hidden_states = jax.random.normal(k_x, (B, S, D), dtype=jnp.float32)
    hidden_states_ent = jax.random.normal(k_e, (B, S, E), dtype=jnp.float32)

    # deterministic synthetic parameters (nn.Linear-like scale), stored as [in, out]
    w1 = jax.random.uniform(k_w1, (D, I), minval=-1.0, maxval=1.0) / jnp.sqrt(D)
    b1 = jax.random.uniform(k_b1, (I,), minval=-1.0, maxval=1.0) / jnp.sqrt(D)
    w2 = jax.random.uniform(k_w2, (E, I), minval=-1.0, maxval=1.0) / jnp.sqrt(E)
    b2 = jax.random.uniform(k_b2, (I,), minval=-1.0, maxval=1.0) / jnp.sqrt(E)

    out = intermediate_layer(hidden_states, hidden_states_ent, w1, b1, w2, b2)
    out = jax.block_until_ready(out)

    ref = _reference(hidden_states, hidden_states_ent, w1, b1, w2, b2)
    assert out.shape == (B, S, I), out.shape
    assert jnp.allclose(out, ref, atol=1e-5, rtol=1e-5), float(jnp.max(jnp.abs(out - ref)))

    print("KERNEL_OK")
</pallas_src>

<mosaic_0001>
module attributes {stable_mosaic.version = 11 : i64} {
  func.func @_intermediate_kernel(%arg0: i32, %arg1: memref<16x32xf32, #tpu.memory_space<vmem>>, %arg2: memref<16x512xf32, #tpu.memory_space<vmem>>, %arg3: memref<32x128xf32, #tpu.memory_space<vmem>>, %arg4: memref<512x128xf32, #tpu.memory_space<vmem>>, %arg5: memref<1x128xf32, #tpu.memory_space<vmem>>, %arg6: memref<16x128xf32, #tpu.memory_space<vmem>>) attributes {dimension_semantics = [#tpu.dimension_semantics<parallel>], iteration_bounds = array<i64: 1>, scalar_prefetch = 0 : i64, scratch_operands = 0 : i64, tpu.core_type = #tpu.core_type<tc>, window_params = [{transform_indices = @transform_0, window_bounds = array<i64: 16, 32>}, {transform_indices = @transform_1, window_bounds = array<i64: 16, 512>}, {pipeline_mode = #tpu.pipeline_mode<synchronous>, transform_indices = @transform_2, window_bounds = array<i64: 32, 128>}, {pipeline_mode = #tpu.pipeline_mode<synchronous>, transform_indices = @transform_3, window_bounds = array<i64: 512, 128>}, {pipeline_mode = #tpu.pipeline_mode<synchronous>, transform_indices = @transform_4, window_bounds = array<i64: 1, 128>}, {transform_indices = @transform_5, window_bounds = array<i64: 16, 128>}]} {
    %c0 = arith.constant 0 : index
    %c0_0 = arith.constant 0 : index
    %0 = vector.load %arg1[%c0, %c0_0] : memref<16x32xf32, #tpu.memory_space<vmem>>, vector<16x32xf32>
    %c0_1 = arith.constant 0 : index
    %c0_2 = arith.constant 0 : index
    %1 = vector.load %arg3[%c0_1, %c0_2] : memref<32x128xf32, #tpu.memory_space<vmem>>, vector<32x128xf32>
    %cst = arith.constant dense<0.000000e+00> : vector<16x128xf32>
    %2 = tpu.matmul %0, %1, %cst {dimension_numbers = #tpu.dot_dimension_numbers<[1], [0], [0], [1], [0, 0, 1, 1], [], []>} : vector<16x32xf32>, vector<32x128xf32>, vector<16x128xf32> -> vector<16x128xf32>
    %c0_3 = arith.constant 0 : index
    %c0_4 = arith.constant 0 : index
    %3 = vector.load %arg2[%c0_3, %c0_4] : memref<16x512xf32, #tpu.memory_space<vmem>>, vector<16x512xf32>
    %c0_5 = arith.constant 0 : index
    %c0_6 = arith.constant 0 : index
    %4 = vector.load %arg4[%c0_5, %c0_6] : memref<512x128xf32, #tpu.memory_space<vmem>>, vector<512x128xf32>
    %cst_7 = arith.constant dense<0.000000e+00> : vector<16x128xf32>
    %5 = tpu.matmul %3, %4, %cst_7 {dimension_numbers = #tpu.dot_dimension_numbers<[1], [0], [0], [1], [0, 0, 1, 1], [], []>} : vector<16x512xf32>, vector<512x128xf32>, vector<16x128xf32> -> vector<16x128xf32>
    %6 = arith.addf %2, %5 : vector<16x128xf32>
    %c0_8 = arith.constant 0 : index
    %c0_9 = arith.constant 0 : index
    %7 = vector.load %arg5[%c0_8, %c0_9] : memref<1x128xf32, #tpu.memory_space<vmem>>, vector<1x128xf32>
    %8 = vector.broadcast %7 : vector<1x128xf32> to vector<16x128xf32>
    %9 = arith.addf %6, %8 : vector<16x128xf32>
    %cst_10 = arith.constant 5.000000e-01 : f32
    %10 = vector.broadcast %cst_10 : f32 to vector<16x128xf32>
    %11 = arith.mulf %9, %10 : vector<16x128xf32>
    %cst_11 = arith.constant 0.707106769 : f32
    %12 = vector.broadcast %cst_11 : f32 to vector<16x128xf32>
    %13 = arith.mulf %9, %12 : vector<16x128xf32>
    %14 = math.erf %13 : vector<16x128xf32>
    %cst_12 = arith.constant 1.000000e+00 : f32
    %15 = vector.broadcast %cst_12 : f32 to vector<16x128xf32>
    %16 = arith.addf %15, %14 : vector<16x128xf32>
    %17 = arith.mulf %11, %16 : vector<16x128xf32>
    %c0_13 = arith.constant 0 : index
    %c0_14 = arith.constant 0 : index
    %18 = vector.load %arg6[%c0_13, %c0_14] : memref<16x128xf32, #tpu.memory_space<vmem>>, vector<16x128xf32>
    tpu.vector_store %arg6[%c0_13, %c0_14], %17 {strides = array<i32>} : memref<16x128xf32, #tpu.memory_space<vmem>>, vector<16x128xf32>,
    return
  }
  func.func @transform_0(%arg0: i32) -> (i32, i32) {
    %c0_i32 = arith.constant 0 : i32
    %c0_i32_0 = arith.constant 0 : i32
    return %arg0, %c0_i32 : i32, i32
  }
  func.func @transform_1(%arg0: i32) -> (i32, i32) {
    %c0_i32 = arith.constant 0 : i32
    %c0_i32_0 = arith.constant 0 : i32
    return %arg0, %c0_i32 : i32, i32
  }
  func.func @transform_2(%arg0: i32) -> (i32, i32) {
    %c0_i32 = arith.constant 0 : i32
    %c0_i32_0 = arith.constant 0 : i32
    %c0_i32_1 = arith.constant 0 : i32
    return %c0_i32, %c0_i32_0 : i32, i32
  }
  func.func @transform_3(%arg0: i32) -> (i32, i32) {
    %c0_i32 = arith.constant 0 : i32
    %c0_i32_0 = arith.constant 0 : i32
    %c0_i32_1 = arith.constant 0 : i32
    return %c0_i32, %c0_i32_0 : i32, i32
  }
  func.func @transform_4(%arg0: i32) -> (i32, i32) {
    %c0_i32 = arith.constant 0 : i32
    %c0_i32_0 = arith.constant 0 : i32
    %c0_i32_1 = arith.constant 0 : i32
    return %c0_i32, %c0_i32_0 : i32, i32
  }
  func.func @transform_5(%arg0: i32) -> (i32, i32) {
    %c0_i32 = arith.constant 0 : i32
    %c0_i32_0 = arith.constant 0 : i32
    return %arg0, %c0_i32 : i32, i32
  }
}

</mosaic_0001>

<bundles_post_ra>
// kernel: tpu_custom_call.1
= control target key start
LH: loop header
LB: loop body
LE: loop exit
PB: predicated region body
PF: predicated region fallthrough
CT: control target
= control target key end

     0   :  { %10 = vsyncpa [#allocation3], 0  ;;  %s712_s0 = inlined_call_operand.hbm [shape: f32[16,32], index: 0, kind: input, shape index: {}]   ;;  %s713_s1 = inlined_call_operand.hbm [shape: f32[16,512], index: 1, kind: input, shape index: {}]   ;;  %s714_s2 = inlined_call_operand.hbm [shape: f32[32,128], index: 2, kind: input, shape index: {}]   ;;  %s715_s3 = inlined_call_operand.hbm [shape: f32[512,128], index: 3, kind: input, shape index: {}]   ;;  %s716_s4 = inlined_call_operand.vmem [shape: f32[1,128], index: 4, kind: input, shape index: {}]   ;;  %s717_s5 = inlined_call_operand.hbm [shape: f32[16,128], index: 5, kind: output, shape index: {}]  }
   0x1   :  { %11 = vsyncpa [#allocation6], 0 }
   0x2   :  { %12 = vsyncpa [#allocation9], 0 }
   0x3   :  { %13 = vsyncpa [#allocation4], 0  ;;  %s643_s18 = smov [#allocation5]  }
   0x4   :  { %s31_s19 = sshll.u32 %s643_s18, 4  ;;  %s32_s19 = int_to_ptr.vmem [resolvable:$true] %s31_s19 }
   0x5   :  { %s543_s20 = scalar_lea.vmem %s32_s19, 1024  ;;  %p548_p1 = scmp.lt.s32.totalorder %s32_s19, %s32_s19 }
   0x6   :  { %p544_p0 = scmp.ne.s32.totalorder %s32_s19, %s543_s20  ;;  %p549_p2 = scmp.lt.s32.totalorder %s543_s20, %s543_s20 }
   0x8   :  { %p550_p3 = por %p549_p2, %p548_p1 }
   0xa   :  { %p551_p4 = pnand %p550_p3, %p544_p0 }
   0xc   :  { %554 = shalt.err (!%p551_p4)
}
   0xd   :  { %s644_s21 = smov 512   ;;  %s645_s22 = smov 32  }
   0xe   :  { %37 = dma.hbm_to_vmem [thread:$0]  %s713_s1, 1024, %s32_s19, [#allocation6], %s644_s21, %s644_s21, %s645_s22  }
   0xf   :  { %s646_s25 = smov [#allocation2]  }
  0x10   :  { %s19_s26 = sshll.u32 %s646_s25, 4  ;;  %s20_s26 = int_to_ptr.vmem [resolvable:$true] %s19_s26 }
  0x11   :  { %s563_s27 = scalar_lea.vmem %s20_s26, 256  ;;  %p568_p6 = scmp.lt.s32.totalorder %s20_s26, %s20_s26 }
  0x12   :  { %p564_p5 = scmp.ne.s32.totalorder %s20_s26, %s563_s27  ;;  %p569_p7 = scmp.lt.s32.totalorder %s563_s27, %s563_s27 }
  0x14   :  { %p570_p8 = por %p569_p7, %p568_p6 }
  0x16   :  { %p571_p9 = pnand %p570_p8, %p564_p5 }
  0x18   :  { %574 = shalt.err (!%p571_p9)
}
  0x19   :  { %s647_s28 = smov 128   ;;  %s648_s29 = smov 8  }
  0x1a   :  { %25 = dma.hbm_to_vmem [thread:$0]  %s712_s0, 256, %s20_s26, [#allocation3], %s647_s28, %s647_s28, %s648_s29  }
  0x1b   :  { %s649_s1 = smov [#allocation7]   ;;  %s650_s8 = smov [#allocation8]  }
  0x1c   :  { %s43_s7 = sshll.u32 %s649_s1, 4  ;;  %s55_s9 = sshll.u32 %s650_s8, 4  ;;  %s44_s7 = int_to_ptr.vmem [resolvable:$true] %s43_s7  ;;  %s56_s9 = int_to_ptr.vmem [resolvable:$true] %s55_s9 }
  0x1d   :  { %s583_s10 = scalar_lea.vmem %s44_s7, 512  ;;  %p588_p11 = scmp.lt.s32.totalorder %s44_s7, %s44_s7 }
  0x1e   :  { %p584_p10 = scmp.ne.s32.totalorder %s44_s7, %s583_s10  ;;  %p589_p12 = scmp.lt.s32.totalorder %s583_s10, %s583_s10 }
  0x20   :  { %p590_p13 = por %p589_p12, %p588_p11 }
  0x22   :  { %p591_p0 = pnand %p590_p13, %p584_p10 }
  0x24   :  { %594 = shalt.err (!%p591_p0)
}
  0x25   :  { %49 = dma.hbm_to_vmem [thread:$0]  %s714_s2, 512, %s44_s7, [#allocation6], %s647_s28, %s647_s28, %s648_s29  }
  0x26   :  { %s603_s0 = scalar_lea.vmem %s56_s9, 8192  ;;  %p608_p2 = scmp.lt.s32.totalorder %s56_s9, %s56_s9 }
  0x27   :  { %p604_p1 = scmp.ne.s32.totalorder %s56_s9, %s603_s0  ;;  %p609_p3 = scmp.lt.s32.totalorder %s603_s0, %s603_s0 }
  0x29   :  { %p610_p4 = por %p609_p3, %p608_p2 }
  0x2b   :  { %p611_p5 = pnand %p610_p4, %p604_p1 }
  0x2d   :  { %614 = shalt.err (!%p611_p5)
}
  0x2e   :  { %61 = dma.hbm_to_vmem [thread:$0]  %s715_s3, 8192, %s56_s9, [#allocation9], %s647_s28, %s647_s28, %s648_s29  }
  0x2f   :  { %635 = dma.done.wait [#allocation3], 256  }
  0x30   :  { %636 = vsyncadd [#allocation3], 4294967040 }
  0x31   :  { %637 = dma.done.wait [#allocation6], 1536  }
  0x32   :  { %638 = vsyncadd [#allocation6], 4294965760 }
  0x33   :  { %639 = dma.done.wait [#allocation9], 8192  }
  0x34   :  { %640 = vsyncadd [#allocation9], 4294959104  ;;  %v121_v0 = vld [vmem:[#allocation8 + $0xf8] sm:$0xff]  ;;  %v120_v4 = vld [vmem:[#allocation8 + $0xf0] sm:$0xff]  ;;  %vm304_vm0 = vcmask 261120   ;;  %s651_s15 = smov [#allocation10]  }
  0x35   :  { %v153_v1 = vld [vmem:[#allocation8 + $0x1f8] sm:$0xff]  ;;  %429 = vmatprep.subr.mxu0 %v121_v0  ;;  %v152_v5 = vld [vmem:[#allocation8 + $0x1f0] sm:$0xff]  ;;  %v119_v8 = vld [vmem:[#allocation8 + $0xe8] sm:$0xff]  ;;  %s412_s16 = sshll.u32 %s651_s15, 4  ;;  %s413_s16 = int_to_ptr.vmem [resolvable:$true] %s412_s16 }
  0x36   :  { %v105_v2 = vld [vmem:[#allocation8 + $0x78] sm:$0xff]  ;;  %467 = vmatprep.subr.mxu1 %v153_v1  ;;  %v104_v6 = vld [vmem:[#allocation8 + $0x70] sm:$0xff]  ;;  %v151_v9 = vld [vmem:[#allocation8 + $0x1e8] sm:$0xff]  ;;  %p620_p7 = scmp.lt.s32.totalorder %s413_s16, %s413_s16 }
  0x37   :  { %v137_v3 = vld [vmem:[#allocation8 + $0x178] sm:$0xff]  ;;  %430 = vmatpush3.msra.mxu0 %v105_v2  ;;  %v136_v7 = vld [vmem:[#allocation8 + $0x170] sm:$0xff]  ;;  %v103_v10 = vld [vmem:[#allocation8 + $0x68] sm:$0xff] }
  0x38   :  { %468 = vmatpush3.msra.mxu1 %v137_v3  ;;  %431 = vmatprep.subr.mxu0 %v120_v4  ;;  %v135_v11 = vld [vmem:[#allocation8 + $0x168] sm:$0xff]  ;;  %v118_v12 = vld [vmem:[#allocation8 + $0xe0] sm:$0xff]  ;;  %v117_v16 = vld [vmem:[#allocation8 + $0xd8] sm:$0xff] }
  0x39   :  { %469 = vmatprep.subr.mxu1 %v152_v5  ;;  %432 = vmatpush3.msra.mxu0 %v104_v6  ;;  %v150_v13 = vld [vmem:[#allocation8 + $0x1e0] sm:$0xff]  ;;  %v149_v17 = vld [vmem:[#allocation8 + $0x1d8] sm:$0xff]  ;;  %v116_v20 = vld [vmem:[#allocation8 + $0xd0] sm:$0xff] }
  0x3a   :  { %470 = vmatpush3.msra.mxu1 %v136_v7  ;;  %433 = vmatprep.subr.mxu0 %v119_v8  ;;  %v102_v14 = vld [vmem:[#allocation8 + $0x60] sm:$0xff]  ;;  %v101_v18 = vld [vmem:[#allocation8 + $0x58] sm:$0xff]  ;;  %v148_v21 = vld [vmem:[#allocation8 + $0x1d0] sm:$0xff] }
  0x3b   :  { %471 = vmatprep.subr.mxu1 %v151_v9  ;;  %v134_v15 = vld [vmem:[#allocation8 + $0x160] sm:$0xff]  ;;  %434 = vmatpush3.msra.mxu0 %v103_v10  ;;  %v133_v19 = vld [vmem:[#allocation8 + $0x158] sm:$0xff]  ;;  %v100_v22 = vld [vmem:[#allocation8 + $0x50] sm:$0xff] }
  0x3c   :  { %472 = vmatpush3.msra.mxu1 %v135_v11  ;;  %435 = vmatprep.subr.mxu0 %v118_v12  ;;  %v132_v23 = vld [vmem:[#allocation8 + $0x150] sm:$0xff]  ;;  %v115_v24 = vld [vmem:[#allocation8 + $0xc8] sm:$0xff]  ;;  %v114_v28 = vld [vmem:[#allocation8 + $0xc0] sm:$0xff] }
  0x3d   :  { %473 = vmatprep.subr.mxu1 %v150_v13  ;;  %436 = vmatpush3.msra.mxu0 %v102_v14  ;;  %v147_v25 = vld [vmem:[#allocation8 + $0x1c8] sm:$0xff]  ;;  %v146_v29 = vld [vmem:[#allocation8 + $0x1c0] sm:$0xff]  ;;  %v113_v32 = vld [vmem:[#allocation8 + $0xb8] sm:$0xff] }
  0x3e   :  { %474 = vmatpush3.msra.mxu1 %v134_v15  ;;  %437 = vmatprep.subr.mxu0 %v117_v16  ;;  %v99_v26 = vld [vmem:[#allocation8 + $0x48] sm:$0xff]  ;;  %v98_v30 = vld [vmem:[#allocation8 + $0x40] sm:$0xff]  ;;  %v145_v33 = vld [vmem:[#allocation8 + $0x1b8] sm:$0xff] }
  0x3f   :  { %475 = vmatprep.subr.mxu1 %v149_v17  ;;  %438 = vmatpush3.msra.mxu0 %v101_v18  ;;  %v131_v27 = vld [vmem:[#allocation8 + $0x148] sm:$0xff]  ;;  %v130_v31 = vld [vmem:[#allocation8 + $0x140] sm:$0xff]  ;;  %v97_v34 = vld [vmem:[#allocation8 + $0x38] sm:$0xff] }
  0x40   :  { %476 = vmatpush3.msra.mxu1 %v133_v19  ;;  %439 = vmatprep.subr.mxu0 %v116_v20  ;;  %v129_v35 = vld [vmem:[#allocation8 + $0x138] sm:$0xff]  ;;  %v112_v36 = vld [vmem:[#allocation8 + $0xb0] sm:$0xff]  ;;  %v111_v40 = vld [vmem:[#allocation8 + $0xa8] sm:$0xff] }
  0x41   :  { %477 = vmatprep.subr.mxu1 %v148_v21  ;;  %440 = vmatpush3.msra.mxu0 %v100_v22  ;;  %v144_v37 = vld [vmem:[#allocation8 + $0x1b0] sm:$0xff]  ;;  %v143_v41 = vld [vmem:[#allocation8 + $0x1a8] sm:$0xff]  ;;  %v110_v44 = vld [vmem:[#allocation8 + $0xa0] sm:$0xff] }
  0x42   :  { %478 = vmatpush3.msra.mxu1 %v132_v23  ;;  %441 = vmatprep.subr.mxu0 %v115_v24  ;;  %v96_v38 = vld [vmem:[#allocation8 + $0x30] sm:$0xff]  ;;  %v95_v42 = vld [vmem:[#allocation8 + $0x28] sm:$0xff]  ;;  %v142_v45 = vld [vmem:[#allocation8 + $0x1a0] sm:$0xff] }
  0x43   :  { %479 = vmatprep.subr.mxu1 %v147_v25  ;;  %442 = vmatpush3.msra.mxu0 %v99_v26  ;;  %v128_v39 = vld [vmem:[#allocation8 + $0x130] sm:$0xff]  ;;  %v127_v43 = vld [vmem:[#allocation8 + $0x128] sm:$0xff]  ;;  %v94_v46 = vld [vmem:[#allocation8 + $0x20] sm:$0xff] }
  0x44   :  { %480 = vmatpush3.msra.mxu1 %v131_v27  ;;  %443 = vmatprep.subr.mxu0 %v114_v28  ;;  %v126_v47 = vld [vmem:[#allocation8 + $0x120] sm:$0xff]  ;;  %v109_v48 = vld [vmem:[#allocation8 + $0x98] sm:$0xff]  ;;  %v108_v52 = vld [vmem:[#allocation8 + $0x90] sm:$0xff] }
  0x45   :  { %481 = vmatprep.subr.mxu1 %v146_v29  ;;  %444 = vmatpush3.msra.mxu0 %v98_v30  ;;  %v141_v49 = vld [vmem:[#allocation8 + $0x198] sm:$0xff]  ;;  %v140_v53 = vld [vmem:[#allocation8 + $0x190] sm:$0xff]  ;;  %v107_v56 = vld [vmem:[#allocation8 + $0x88] sm:$0xff] }
  0x46   :  { %482 = vmatpush3.msra.mxu1 %v130_v31  ;;  %445 = vmatprep.subr.mxu0 %v113_v32  ;;  %v93_v50 = vld [vmem:[#allocation8 + $0x18] sm:$0xff]  ;;  %v92_v54 = vld [vmem:[#allocation8 + $0x10] sm:$0xff]  ;;  %v139_v57 = vld [vmem:[#allocation8 + $0x188] sm:$0xff] }
  0x47   :  { %483 = vmatprep.subr.mxu1 %v145_v33  ;;  %446 = vmatpush3.msra.mxu0 %v97_v34  ;;  %v125_v51 = vld [vmem:[#allocation8 + $0x118] sm:$0xff]  ;;  %v124_v55 = vld [vmem:[#allocation8 + $0x110] sm:$0xff]  ;;  %v91_v58 = vld [vmem:[#allocation8 + $0x8] sm:$0xff] }
  0x48   :  { %484 = vmatpush3.msra.mxu1 %v129_v35  ;;  %447 = vmatprep.subr.mxu0 %v112_v36  ;;  %v123_v59 = vld [vmem:[#allocation8 + $0x108] sm:$0xff]  ;;  %v106_v60 = vld [vmem:[#allocation8 + $0x80] sm:$0xff]  ;;  %v85_v1 = vld [vmem:[#allocation5 + $0x18] sm:$0xff] }
  0x49   :  { %485 = vmatprep.subr.mxu1 %v144_v37  ;;  %448 = vmatpush3.msra.mxu0 %v96_v38  ;;  %v138_v61 = vld [vmem:[#allocation8 + $0x180] sm:$0xff]  ;;  %v83_v63 = vld [vmem:[#allocation5 + $0x8] sm:$0xff]  ;;  %v84_v3 = vld [vmem:[#allocation5 + $0x10] sm:$0xff] }
  0x4a   :  { %486 = vmatpush3.msra.mxu1 %v128_v39  ;;  %449 = vmatprep.subr.mxu0 %v111_v40  ;;  %v90_v62 = vld [vmem:[#allocation8] sm:$0xff]  ;;  %v81_v4 = vld [vmem:[#allocation7 + $0x18] sm:$0xff]  ;;  %v87_v5 = vld [vmem:[#allocation5 + $0x28] sm:$0xff] }
  0x4b   :  { %487 = vmatprep.subr.mxu1 %v143_v41  ;;  %450 = vmatpush3.msra.mxu0 %v95_v42  ;;  %v122_v0 = vld [vmem:[#allocation8 + $0x100] sm:$0xff]  ;;  %v89_v6 = vld [vmem:[#allocation5 + $0x38] sm:$0xff]  ;;  %v80_v7 = vld [vmem:[#allocation7 + $0x10] sm:$0xff] }
  0x4c   :  { %488 = vmatpush3.msra.mxu1 %v127_v43  ;;  %451 = vmatprep.subr.mxu0 %v110_v44  ;;  %v82_v2 = vld [vmem:[#allocation5] sm:$0xff]  ;;  %v88_v8 = vld [vmem:[#allocation5 + $0x30] sm:$0xff]  ;;  %v79_v10 = vld [vmem:[#allocation7 + $0x8] sm:$0xff] }
  0x4d   :  { %489 = vmatprep.subr.mxu1 %v142_v45  ;;  %452 = vmatpush3.msra.mxu0 %v94_v46  ;;  %v86_v9 = vld [vmem:[#allocation5 + $0x20] sm:$0xff]  ;;  %v76_v11 = vld [vmem:[#allocation2] sm:$0xff]  ;;  %v77_v13 = vld [vmem:[#allocation2 + $0x8] sm:$0xff] }
  0x4e   :  { %490 = vmatpush3.msra.mxu1 %v126_v47  ;;  %453 = vmatprep.subr.mxu0 %v109_v48  ;;  %v78_v12 = vld [vmem:[#allocation7] sm:$0xff]  ;;  %v428_v29 = vld [vmem:[%s716_s4] ss:$0 sm:$0xff]  ;;  %s615_s4 = scalar_lea.vmem %s413_s16, 256 }
  0x4f   :  { %491 = vmatprep.subr.mxu1 %v141_v49  ;;  %454 = vmatpush3.msra.mxu0 %v93_v50  ;;  %p616_p6 = scmp.ne.s32.totalorder %s413_s16, %s615_s4  ;;  %p621_p8 = scmp.lt.s32.totalorder %s615_s4, %s615_s4 }
  0x50   :  { %492 = vmatpush3.msra.mxu1 %v125_v51  ;;  %455 = vmatprep.subr.mxu0 %v108_v52 }
  0x51   :  { %493 = vmatprep.subr.mxu1 %v140_v53  ;;  %456 = vmatpush3.msra.mxu0 %v92_v54  ;;  %p622_p9 = por %p621_p8, %p620_p7 }
  0x52   :  { %494 = vmatpush3.msra.mxu1 %v124_v55  ;;  %457 = vmatprep.subr.mxu0 %v107_v56 }
  0x53   :  { %495 = vmatprep.subr.mxu1 %v139_v57  ;;  %458 = vmatpush3.msra.mxu0 %v91_v58  ;;  %p623_p10 = pnand %p622_p9, %p616_p6 }
  0x54   :  { %496 = vmatpush3.msra.mxu1 %v123_v59  ;;  %459 = vmatprep.subr.mxu0 %v106_v60 }
  0x55   :  { %497 = vmatprep.subr.mxu1 %v138_v61  ;;  %460 = vmatpush3.msra.mxu0 %v90_v62 }
  0x56   :  { %218 = vmatprep.mubr.f32.mxu0 %v83_v63  ;;  %498 = vmatpush3.msra.mxu1 %v122_v0 }
  0x57   :  { %293 = vmatprep.mubr.f32.mxu1 %v85_v1  ;;  %219 = vmatmul.mubr.f32.vlgmr.msra.gmra.mxu0 %v82_v2 }
  0x58   :  { %294 = vmatmul.mubr.f32.vlgmr.msra.gmra.mxu1 %v84_v3  ;;  %511 = vmatprep.subr.mxu0 %v81_v4 }
  0x59   :  { %223 = vmatprep.mubr.f32.mxu0 %v87_v5  ;;  %512 = vmatpush3.msra.mxu0 %v81_v4 }
  0x5a   :  { %298 = vmatprep.mubr.f32.mxu1 %v89_v6  ;;  %513 = vmatprep.subr.mxu0 %v80_v7 }
  0x5b   :  { %514 = vmatpush3.msra.mxu0 %v80_v7 }
  0x5c   :  { %299 = vmatmul.mubr.f32.gmra.mxu1 %v88_v8  ;;  %224 = vmatmul.mubr.f32.gmra.mxu0 %v86_v9 }
  0x5d   :  { %515 = vmatprep.subr.mxu0 %v79_v10  ;;  %519 = vmatprep.mubr.msk.f32.mxu0 %vm304_vm0, %v76_v11 }
  0x5e   :  { %516 = vmatpush3.msra.mxu0 %v79_v10 }
  0x5f   :  { %517 = vmatprep.subr.mxu0 %v78_v12 }
  0x60   :  { %518 = vmatpush3.msra.mxu0 %v78_v12 }
  0x61   :  { %520 = vmatmul.mubr.msk.f32.vlgmr.msra.gmra.mxu0 %vm304_vm0, %v77_v13 }
 0x117   :  { %v461_v14 = vpop.f32.mrf.mxu0 }
 0x118   :  { %v499_v15 = vpop.f32.mrf.mxu1 }
 0x119   :  { %v462_v16 = vpop.f32.mrf.mxu0 }
 0x11a   :  { %v500_v17 = vpop.f32.mrf.mxu1  ;;  %v463_v20 = vadd.f32 %v462_v16, %v461_v14 }
 0x11b   :  { %v501_v21 = vadd.f32 %v500_v17, %v499_v15 }
 0x11c   :  { %v502_v18 = vpop.f32.mrf.mxu1  ;;  %v464_v19 = vpop.f32.mrf.mxu0 }
 0x11d   :  { %v296_v28 = vadd.f32 %v501_v21, %v463_v20 }
 0x11e   :  { %v503_v22 = vpop.f32.mrf.mxu1  ;;  %v465_v23 = vpop.f32.mrf.mxu0 }
 0x11f   :  { %v504_v24 = vadd.f32 %v503_v22, %v502_v18  ;;  %v466_v25 = vadd.f32 %v465_v23, %v464_v19 }
 0x121   :  { %v521_v26 = vpop.f32.mrf.mxu0  ;;  %v301_v27 = vadd.f32 %v504_v24, %v466_v25 }
 0x123   :  { %v377_v30 = vpop.f32.mrf.mxu0  ;;  %v383_v31 = vadd.f32 %v521_v26, %v301_v27 }
 0x124   :  { %v378_v32 = vadd.f32 %v377_v30, %v296_v28 }
 0x125   :  { %v394_v33 = vadd.f32 %v428_v29, %v383_v31 }
 0x126   :  { %v393_v34 = vadd.f32 %v428_v29, %v378_v32 }
 0x127   :  { %v398_v35 = vmul.f32 0.70710677, %v394_v33  ;;  %v396_v39 = vmul.f32 0.5, %v394_v33 }
 0x128   :  { %v397_v36 = vmul.f32 0.70710677, %v393_v34  ;;  %v395_v41 = vmul.f32 0.5, %v393_v34 }
 0x129   :  { %531 = verf.f32 %v398_v35 }
 0x12a   :  { %533 = verf.f32 %v397_v36 }
 0x136   :  { %v532_v37 = vpop.eup %531 }
 0x137   :  { %v534_v38 = vpop.eup %533  ;;  %v402_v40 = vadd.f32 1.0, %v532_v37 }
 0x138   :  { %v401_v42 = vadd.f32 1.0, %v534_v38 }
 0x139   :  { %v404_v43 = vmul.f32 %v402_v40, %v396_v39 }
 0x13a   :  { %v403_v44 = vmul.f32 %v401_v42, %v395_v41 }
 0x13b   :  { %406 = vst [vmem:[#allocation10 + $0x8] sm:$0xff] %v404_v43 }
 0x13c   :  { %405 = vst [vmem:[#allocation10] sm:$0xff] %v403_v44 }
 0x13d   :  { %626 = shalt.err (!%p623_p10)
}
 0x13e   :  { %418 = dma.vmem_to_hbm [thread:$0]  %s413_s16, 256, %s717_s5, [#allocation4], %s647_s28, %s647_s28, %s648_s29  }
 0x13f   :  { %641 = dma.done.wait [#allocation4], 256  }
 0x140   :  { %642 = vsyncadd [#allocation4], 4294967040 }
 0x141   :  { %422 = vsyncpa [#allocation3], 1 }
 0x142   :  { %423 = vsyncpa [#allocation6], 1 }
 0x143   :  { %424 = vsyncpa [#allocation9], 1 }
 0x144   :  { %425 = vsyncpa [#allocation4], 1 }

</bundles_post_ra>
